<compile_context>
chip_gen: v5e
topology: v5e:2x2
jax: 0.10.0
libtpu: 0.0.40
codegen_flags: <defaults>
</compile_context>

<pallas_src>
import jax
import jax.numpy as jnp
from jax.experimental import pallas as pl
from jax.experimental.pallas import tpu as pltpu


def _round_up(x, m):
    return ((x + m - 1) // m) * m


def dqn_mlp_kernel(x_ref, w1_ref, b1_ref, w2_ref, b2_ref, out_ref):
    # fc1 + ReLU: MXU matmul with f32 accumulation, bias add + ReLU on the VPU.
    h = jnp.dot(x_ref[...], w1_ref[...], preferred_element_type=jnp.float32)
    h = jnp.maximum(h + b1_ref[...], 0.0)                       # (tb, H) + (1, H)
    # fc2: MXU matmul against the lane-padded (H, A_mxu) weight, then slice to
    # the real A before the store so HBM writeback is (tb, A), not (tb, 128).
    y = jnp.dot(h.astype(w2_ref.dtype), w2_ref[...],
                preferred_element_type=jnp.float32)
    a = out_ref.shape[-1]
    out_ref[...] = (y[:, :a] + b2_ref[...]).astype(out_ref.dtype)


def prepare_params(w1, b1, w2, b2, *, compute_dtype=jnp.float32):
    """One-time packing of the weights for the Pallas forward.

    w1: (D, H); b1: (H,); w2: (H, A); b2: (A,)  (in_features, out_features
    layout, i.e. the kernel computes x @ W + b == PyTorch x @ W.T + b).
    Only w2 is lane-padded (MXU operand); biases are reshaped to 2-D rows.
    Use compute_dtype=jnp.bfloat16 for large-batch runs on v5e/v6e.
    """
    D, H = w1.shape
    A = w2.shape[1]
    A_mxu = _round_up(A, 128)
    return {
        "w1": w1.astype(compute_dtype),
        "b1": b1.reshape(1, H).astype(jnp.float32),
        "w2": jnp.pad(w2, ((0, 0), (0, A_mxu - A))).astype(compute_dtype),
        "b2": b2.reshape(1, A).astype(jnp.float32),
    }


def linear_deep_q_network_forward(state, params, *, tb_max=8192,
                                  min_batch_for_split=512):
    """actions = fc2(relu(fc1(state))).  state: (B, D) -> (B, A) f32."""
    w1_c, b1_2d, w2_c, b2_2d = params["w1"], params["b1"], params["w2"], params["b2"]
    B, D = state.shape
    H = w1_c.shape[1]
    A = b2_2d.shape[1]
    A_mxu = w2_c.shape[1]
    compute_dtype = w1_c.dtype

    # Balanced batch tiling: tb is a multiple of 8, padding < 8 rows per tile.
    tb_max = max(8, (tb_max // 8) * 8)
    nsteps = pl.cdiv(B, tb_max)
    if B >= min_batch_for_split:
        nsteps = max(nsteps, 2)          # >= 2 steps so both v7x TCs get work
    tb = _round_up(pl.cdiv(B, nsteps), 8)
    B_pad = nsteps * tb

    x = state.astype(compute_dtype)
    if B_pad != B:
        x = jnp.pad(x, ((0, B_pad - B), (0, 0)))

    itemsize = jnp.dtype(compute_dtype).itemsize
    cost = pl.CostEstimate(
        flops=2 * B_pad * (D * H + H * A_mxu),
        transcendentals=0,
        bytes_accessed=(itemsize * (B_pad * D + D * H + H * A_mxu)
                        + 4 * (H + A + B_pad * A)),
    )

    vmem = pltpu.MemorySpace.VMEM
    out_pad = pl.pallas_call(
        dqn_mlp_kernel,
        out_shape=jax.ShapeDtypeStruct((B_pad, A), jnp.float32),
        grid_spec=pltpu.PrefetchScalarGridSpec(
            num_scalar_prefetch=0,
            grid=(nsteps,),
            in_specs=[
                # x tile: streams through the pipeline, one batch tile per step.
                pl.BlockSpec((tb, D), lambda i: (i, 0), memory_space=vmem),
                # Weights / biases: same block every step -> stay VMEM-resident.
                pl.BlockSpec((D, H), lambda i: (0, 0), memory_space=vmem),
                pl.BlockSpec((1, H), lambda i: (0, 0), memory_space=vmem),
                pl.BlockSpec((H, A_mxu), lambda i: (0, 0), memory_space=vmem),
                pl.BlockSpec((1, A), lambda i: (0, 0), memory_space=vmem),
            ],
            # Unpadded (tb, A) output tiles: no 32x lane amplification on the
            # HBM writeback and no second slice pass in the wrapper.
            out_specs=pl.BlockSpec((tb, A), lambda i: (i, 0), memory_space=vmem),
        ),
        compiler_params=pltpu.CompilerParams(
            dimension_semantics=("parallel",),   # batch tiles are independent
        ),
        cost_estimate=cost,
    )(x, w1_c, b1_2d, w2_c, b2_2d)

    return out_pad if B_pad == B else out_pad[:B]


def init_params(key, input_dim, hidden, n_actions):
    """Deterministic init mimicking nn.Linear's uniform(-1/sqrt(fan_in), +)."""
    k1, k2, k3, k4 = jax.random.split(key, 4)
    bound1 = 1.0 / jnp.sqrt(jnp.float32(input_dim))
    bound2 = 1.0 / jnp.sqrt(jnp.float32(hidden))
    w1 = jax.random.uniform(k1, (input_dim, hidden), jnp.float32, -bound1, bound1)
    b1 = jax.random.uniform(k2, (hidden,), jnp.float32, -bound1, bound1)
    w2 = jax.random.uniform(k3, (hidden, n_actions), jnp.float32, -bound2, bound2)
    b2 = jax.random.uniform(k4, (n_actions,), jnp.float32, -bound2, bound2)
    return w1, b1, w2, b2


# TODO(synk): optimizer (Adam), MSELoss and device placement from the PyTorch
# module are training-time housekeeping; only forward() is implemented here.

if __name__ == "__main__":
    # Shapes implied by the module: input_dims=(8,), hidden=128, n_actions=4.
    B, D, H, A = 8, 8, 128, 4

    key = jax.random.PRNGKey(0)
    k_params, k_state, k_state2 = jax.random.split(key, 3)
    w1, b1, w2, b2 = init_params(k_params, D, H, A)
    params = prepare_params(w1, b1, w2, b2)      # one-time weight packing

    # Tiny batch: single grid step, unpadded (8, 4) output.
    state = jax.random.normal(k_state, (B, D), jnp.float32)
    actions = jax.block_until_ready(
        linear_deep_q_network_forward(state, params))
    ref = jnp.maximum(state @ w1 + b1, 0.0) @ w2 + b2
    assert actions.shape == (B, A)
    assert jnp.allclose(actions, ref, atol=1e-5, rtol=1e-5)

    # Non-multiple batch with a small tb_max: exercises balanced tiling
    # (2 tiles of 104 rows, 8 rows padding) and the multi-step parallel grid.
    B2 = 200
    state2 = jax.random.normal(k_state2, (B2, D), jnp.float32)
    actions2 = jax.block_until_ready(
        linear_deep_q_network_forward(state2, params, tb_max=128))
    ref2 = jnp.maximum(state2 @ w1 + b1, 0.0) @ w2 + b2
    assert actions2.shape == (B2, A)
    assert jnp.allclose(actions2, ref2, atol=1e-5, rtol=1e-5)

    print("KERNEL_OK")
</pallas_src>

<mosaic_0001>
module attributes {stable_mosaic.version = 11 : i64} {
  func.func @dqn_mlp_kernel(%arg0: i32, %arg1: memref<8x8xf32, #tpu.memory_space<vmem>>, %arg2: memref<8x128xf32, #tpu.memory_space<vmem>>, %arg3: memref<1x128xf32, #tpu.memory_space<vmem>>, %arg4: memref<128x128xf32, #tpu.memory_space<vmem>>, %arg5: memref<1x4xf32, #tpu.memory_space<vmem>>, %arg6: memref<8x4xf32, #tpu.memory_space<vmem>>) attributes {dimension_semantics = [#tpu.dimension_semantics<parallel>], iteration_bounds = array<i64: 1>, scalar_prefetch = 0 : i64, scratch_operands = 0 : i64, tpu.core_type = #tpu.core_type<tc>, window_params = [{transform_indices = @transform_0, window_bounds = array<i64: 8, 8>}, {pipeline_mode = #tpu.pipeline_mode<synchronous>, transform_indices = @transform_1, window_bounds = array<i64: 8, 128>}, {pipeline_mode = #tpu.pipeline_mode<synchronous>, transform_indices = @transform_2, window_bounds = array<i64: 1, 128>}, {pipeline_mode = #tpu.pipeline_mode<synchronous>, transform_indices = @transform_3, window_bounds = array<i64: 128, 128>}, {pipeline_mode = #tpu.pipeline_mode<synchronous>, transform_indices = @transform_4, window_bounds = array<i64: 1, 4>}, {transform_indices = @transform_5, window_bounds = array<i64: 8, 4>}]} {
    %c0 = arith.constant 0 : index
    %c0_0 = arith.constant 0 : index
    %0 = vector.load %arg1[%c0, %c0_0] : memref<8x8xf32, #tpu.memory_space<vmem>>, vector<8x8xf32>
    %c0_1 = arith.constant 0 : index
    %c0_2 = arith.constant 0 : index
    %1 = vector.load %arg2[%c0_1, %c0_2] : memref<8x128xf32, #tpu.memory_space<vmem>>, vector<8x128xf32>
    %cst = arith.constant dense<0.000000e+00> : vector<8x128xf32>
    %2 = tpu.matmul %0, %1, %cst {dimension_numbers = #tpu.dot_dimension_numbers<[1], [0], [0], [1], [0, 0, 1, 1], [], []>} : vector<8x8xf32>, vector<8x128xf32>, vector<8x128xf32> -> vector<8x128xf32>
    %c0_3 = arith.constant 0 : index
    %c0_4 = arith.constant 0 : index
    %3 = vector.load %arg3[%c0_3, %c0_4] : memref<1x128xf32, #tpu.memory_space<vmem>>, vector<1x128xf32>
    %4 = vector.broadcast %3 : vector<1x128xf32> to vector<8x128xf32>
    %5 = arith.addf %2, %4 : vector<8x128xf32>
    %cst_5 = arith.constant 0.000000e+00 : f32
    %6 = vector.broadcast %cst_5 : f32 to vector<8x128xf32>
    %7 = arith.maximumf %5, %6 : vector<8x128xf32>
    %c0_6 = arith.constant 0 : index
    %c0_7 = arith.constant 0 : index
    %8 = vector.load %arg4[%c0_6, %c0_7] : memref<128x128xf32, #tpu.memory_space<vmem>>, vector<128x128xf32>
    %cst_8 = arith.constant dense<0.000000e+00> : vector<8x128xf32>
    %9 = tpu.matmul %7, %8, %cst_8 {dimension_numbers = #tpu.dot_dimension_numbers<[1], [0], [0], [1], [0, 0, 1, 1], [], []>} : vector<8x128xf32>, vector<128x128xf32>, vector<8x128xf32> -> vector<8x128xf32>
    %10 = vector.extract_strided_slice %9 {offsets = [0, 0], sizes = [8, 4], strides = [1, 1]} : vector<8x128xf32> to vector<8x4xf32>
    %c0_9 = arith.constant 0 : index
    %c0_10 = arith.constant 0 : index
    %11 = vector.load %arg5[%c0_9, %c0_10] : memref<1x4xf32, #tpu.memory_space<vmem>>, vector<1x4xf32>
    %12 = vector.broadcast %11 : vector<1x4xf32> to vector<8x4xf32>
    %13 = arith.addf %10, %12 : vector<8x4xf32>
    %c0_11 = arith.constant 0 : index
    %c0_12 = arith.constant 0 : index
    %14 = vector.load %arg6[%c0_11, %c0_12] : memref<8x4xf32, #tpu.memory_space<vmem>>, vector<8x4xf32>
    tpu.vector_store %arg6[%c0_11, %c0_12], %13 {strides = array<i32>} : memref<8x4xf32, #tpu.memory_space<vmem>>, vector<8x4xf32>,
    return
  }
  func.func @transform_0(%arg0: i32) -> (i32, i32) {
    %c0_i32 = arith.constant 0 : i32
    %c0_i32_0 = arith.constant 0 : i32
    return %arg0, %c0_i32 : i32, i32
  }
  func.func @transform_1(%arg0: i32) -> (i32, i32) {
    %c0_i32 = arith.constant 0 : i32
    %c0_i32_0 = arith.constant 0 : i32
    %c0_i32_1 = arith.constant 0 : i32
    return %c0_i32, %c0_i32_0 : i32, i32
  }
  func.func @transform_2(%arg0: i32) -> (i32, i32) {
    %c0_i32 = arith.constant 0 : i32
    %c0_i32_0 = arith.constant 0 : i32
    %c0_i32_1 = arith.constant 0 : i32
    return %c0_i32, %c0_i32_0 : i32, i32
  }
  func.func @transform_3(%arg0: i32) -> (i32, i32) {
    %c0_i32 = arith.constant 0 : i32
    %c0_i32_0 = arith.constant 0 : i32
    %c0_i32_1 = arith.constant 0 : i32
    return %c0_i32, %c0_i32_0 : i32, i32
  }
  func.func @transform_4(%arg0: i32) -> (i32, i32) {
    %c0_i32 = arith.constant 0 : i32
    %c0_i32_0 = arith.constant 0 : i32
    %c0_i32_1 = arith.constant 0 : i32
    return %c0_i32, %c0_i32_0 : i32, i32
  }
  func.func @transform_5(%arg0: i32) -> (i32, i32) {
    %c0_i32 = arith.constant 0 : i32
    %c0_i32_0 = arith.constant 0 : i32
    return %arg0, %c0_i32 : i32, i32
  }
}

</mosaic_0001>

<bundles_post_ra>
// kernel: tpu_custom_call.1
= control target key start
LH: loop header
LB: loop body
LE: loop exit
PB: predicated region body
PF: predicated region fallthrough
CT: control target
= control target key end

     0   :  { %10 = vsyncpa [#allocation3], 0  ;;  %s280_s0 = inlined_call_operand.hbm [shape: f32[8,8], index: 0, kind: input, shape index: {}]   ;;  %s281_s1 = inlined_call_operand.hbm [shape: f32[8,128], index: 1, kind: input, shape index: {}]   ;;  %s282_s2 = inlined_call_operand.vmem [shape: f32[1,128], index: 2, kind: input, shape index: {}]   ;;  %s283_s3 = inlined_call_operand.hbm [shape: f32[128,128], index: 3, kind: input, shape index: {}]   ;;  %s284_s4 = inlined_call_operand.vmem [shape: f32[1,4], index: 4, kind: input, shape index: {}]   ;;  %s285_s5 = inlined_call_operand.vmem [shape: f32[8,4], index: 5, kind: output, shape index: {}]  }
   0x1   :  { %11 = vsyncpa [#allocation5], 0  ;;  %s28_s20 = sshll.u32 %s281_s1, 4  ;;  %s227_s21 = smov [#allocation4]   ;;  %s29_s20 = int_to_ptr.hbm [resolvable:$true] %s28_s20 }
   0x2   :  { %s30_s22 = sshll.u32 %s227_s21, 4  ;;  %s17_s25 = sshll.u32 %s280_s0, 4  ;;  %s31_s22 = int_to_ptr.vmem [resolvable:$true] %s30_s22  ;;  %s18_s25 = int_to_ptr.hbm [resolvable:$true] %s17_s25 }
   0x3   :  { %33 = dma.hbm_to_vmem [thread:$0]  %s29_s20, 128, %s31_s22, [#allocation5]  }
   0x4   :  { %s228_s26 = smov [#allocation2]   ;;  %s40_s30 = sshll.u32 %s283_s3, 4  ;;  %s41_s30 = int_to_ptr.hbm [resolvable:$true] %s40_s30 }
   0x5   :  { %s19_s27 = sshll.u32 %s228_s26, 4  ;;  %s229_s1 = smov [#allocation6]   ;;  %s20_s27 = int_to_ptr.vmem [resolvable:$true] %s19_s27 }
   0x6   :  { %22 = dma.hbm_to_vmem [thread:$0]  %s18_s25, 128, %s20_s27, [#allocation3]  }
   0x7   :  { %s42_s6 = sshll.u32 %s229_s1, 4  ;;  %s230_s7 = smov 128   ;;  %s43_s6 = int_to_ptr.vmem [resolvable:$true] %s42_s6 }
   0x8   :  { %s231_s8 = smov 8  }
   0x9   :  { %48 = dma.hbm_to_vmem [thread:$0]  %s41_s30, 2048, %s43_s6, [#allocation5], %s230_s7, %s230_s7, %s231_s8  }
   0xa   :  { %223 = dma.done.wait [#allocation3], 128  }
   0xb   :  { %224 = vsyncadd [#allocation3], 4294967168 }
   0xc   :  { %225 = dma.done.wait [#allocation5], 2176  }
   0xd   :  { %226 = vsyncadd [#allocation5], 4294965120  ;;  %vm69_vm0 = vcmask 64512   ;;  %v64_v0 = vld [vmem:[#allocation4] sm:$0xff]  ;;  %v63_v1 = vld [vmem:[#allocation2] sm:$0xff]  ;;  %vm135_vm1 = vcmask 31744  }
   0xe   :  { %v109_v2 = vld [vmem:[#allocation6 + $0x78] sm:$0xff]  ;;  %88 = vmatpush.msra.mxu0 %v64_v0  ;;  %v108_v3 = vld [vmem:[#allocation6 + $0x70] sm:$0xff]  ;;  %v107_v4 = vld [vmem:[#allocation6 + $0x68] sm:$0xff] }
   0xf   :  { %110 = vmatpush.msra.mxu1 %v109_v2  ;;  %143 = vmatmul.msk.f32.vlgmr.msra.gmra.mxu0 %vm69_vm0, %v63_v1  ;;  %v106_v5 = vld [vmem:[#allocation6 + $0x60] sm:$0xff]  ;;  %v105_v6 = vld [vmem:[#allocation6 + $0x58] sm:$0xff]  ;;  %v104_v7 = vld [vmem:[#allocation6 + $0x50] sm:$0xff] }
  0x10   :  { %v103_v8 = vld [vmem:[#allocation6 + $0x48] sm:$0xff]  ;;  %v102_v9 = vld [vmem:[#allocation6 + $0x40] sm:$0xff]  ;;  %v101_v10 = vld [vmem:[#allocation6 + $0x38] sm:$0xff] }
  0x11   :  { %111 = vmatpush.msra.mxu1 %v108_v3  ;;  %v100_v11 = vld [vmem:[#allocation6 + $0x30] sm:$0xff]  ;;  %v99_v12 = vld [vmem:[#allocation6 + $0x28] sm:$0xff]  ;;  %v98_v13 = vld [vmem:[#allocation6 + $0x20] sm:$0xff] }
  0x12   :  { %v97_v14 = vld [vmem:[#allocation6 + $0x18] sm:$0xff]  ;;  %v96_v15 = vld [vmem:[#allocation6 + $0x10] sm:$0xff]  ;;  %v95_v16 = vld [vmem:[#allocation6 + $0x8] sm:$0xff] }
  0x13   :  { %112 = vmatpush.msra.mxu1 %v107_v4  ;;  %v94_v17 = vld [vmem:[#allocation6] sm:$0xff]  ;;  %v149_v18 = vld [vmem:[%s282_s2] ss:$0 sm:$0xff] }
  0x14   :  { %v150_v22 = vld [vmem:[%s284_s4] ss:$0 sm:$0xff] }
  0x15   :  { %113 = vmatpush.msra.mxu1 %v106_v5 }
  0x17   :  { %114 = vmatpush.msra.mxu1 %v105_v6 }
  0x19   :  { %115 = vmatpush.msra.mxu1 %v104_v7 }
  0x1b   :  { %116 = vmatpush.msra.mxu1 %v103_v8 }
  0x1d   :  { %117 = vmatpush.msra.mxu1 %v102_v9 }
  0x1f   :  { %118 = vmatpush.msra.mxu1 %v101_v10 }
  0x21   :  { %119 = vmatpush.msra.mxu1 %v100_v11 }
  0x23   :  { %120 = vmatpush.msra.mxu1 %v99_v12 }
  0x25   :  { %121 = vmatpush.msra.mxu1 %v98_v13 }
  0x27   :  { %122 = vmatpush.msra.mxu1 %v97_v14 }
  0x29   :  { %123 = vmatpush.msra.mxu1 %v96_v15 }
  0x2b   :  { %124 = vmatpush.msra.mxu1 %v95_v16 }
  0x2d   :  { %125 = vmatpush.msra.mxu1 %v94_v17 }
  0x8c   :  { %v90_v19 = vpop.f32.mrf.mxu0 }
  0x8d   :  { %v91_v20 = vadd.f32 %v149_v18, %v90_v19 }
  0x8f   :  { %v93_v21 = vmax.f32 %v91_v20, 0.0 }
  0x91   :  { %126 = vmatmul.f32.vlgmr.msra.gmra.mxu1 %v93_v21 }
 0x10e   :  { %v127_v23 = vpop.f32.mrf.mxu1 }
 0x10f   :  { %v134_v24 = vadd.f32 %v150_v22, %v127_v23 }
 0x111   :  { %136 = vst.msk [vmem:[%s285_s5] sm:$0xff] %vm135_vm1, %v134_v24 }
 0x112   :  { %141 = vsyncpa [#allocation3], 1 }
 0x113   :  { %142 = vsyncpa [#allocation5], 1 }

</bundles_post_ra>
